<compile_context>
chip_gen: v5e
topology: v5e:2x2
jax: 0.10.0
libtpu: 0.0.40
codegen_flags: <defaults>
</compile_context>

<pallas_src>
import functools

import jax
import jax.numpy as jnp
from jax import lax
from jax.experimental import pallas as pl
from jax.experimental.pallas import tpu as pltpu


def _vmem_capacity_bytes():
    try:
        return int(pltpu.get_tpu_info().vmem_capacity_bytes)
    except Exception:
        return 64 * 1024 * 1024  # conservative (v7x per-TensorCore VMEM)


def _style_loss_kernel(x_ref, y_ref, out_ref, acc_ref, *,
                       hw, tk, kps, needs_mask, emit_gram,
                       gram_scale, inv_mse_denom):
    s = pl.program_id(0)          # K-split index (v7x core split; 1 otherwise)
    k = pl.program_id(2)          # K tile index within the split

    xk = x_ref[0]                 # (C, TK)
    yk = y_ref[0]                 # (C, TK)

    if needs_mask:
        # Zero out the out-of-bounds tail of the (partial) last K tile.
        col = (s * kps + k) * tk + lax.broadcasted_iota(jnp.int32, xk.shape, 1)
        valid = col < hw
        xk = jnp.where(valid, xk, jnp.zeros_like(xk))
        yk = jnp.where(valid, yk, jnp.zeros_like(yk))

    # Contract the HW axis of both operands: (C, TK) x (C, TK) -> (C, C).
    # No explicit transpose -> no XLU / VMEM copy of a (TK, C) tile.
    dn = (((1,), (1,)), ((), ()))
    gx = lax.dot_general(xk, xk, dimension_numbers=dn,
                         preferred_element_type=jnp.float32)
    gy = lax.dot_general(yk, yk, dimension_numbers=dn,
                         preferred_element_type=jnp.float32)
    delta = gx - gy               # additive over HW chunks

    @pl.when(k == 0)
    def _():
        acc_ref[...] = delta      # direct write: no zero-fill + add

    @pl.when(k > 0)
    def _():
        acc_ref[...] = acc_ref[...] + delta

    @pl.when(k == pl.num_programs(2) - 1)
    def _():
        if emit_gram:
            # K-split mode: emit the partial (C, C) gram difference; the
            # cross-split combine + square-sum happens in the wrapper.
            out_ref[0, 0] = acc_ref[...].astype(out_ref.dtype)
        else:
            d = acc_ref[...] * gram_scale          # scale BEFORE squaring
            partial = jnp.sum(d * d) * inv_mse_denom
            out_ref[...] = jnp.broadcast_to(partial, out_ref.shape).astype(
                out_ref.dtype)


def style_loss(x, y, *, compute_dtype=None):
    """x, y: (B, C, H, W). Returns scalar MSE(gram(x), gram(y)) matching the
    PyTorch StyleLoss (per-batch grams, each divided by b*c*h*w).

    compute_dtype: optionally stream inputs in a narrower dtype (e.g.
    jnp.bfloat16) to halve HBM traffic; MXU still accumulates in f32.
    """
    assert x.shape == y.shape
    B, C, H, W = x.shape
    HW = H * W

    xf = x.reshape(B, C, HW)
    yf = y.reshape(B, C, HW)
    if compute_dtype is not None:
        xf = xf.astype(compute_dtype)
        yf = yf.astype(compute_dtype)

    itemsize = jnp.dtype(xf.dtype).itemsize

    # Generation-aware VMEM budgeting (2 inputs x 2 pipeline buffers + scratch).
    vmem_cap = _vmem_capacity_bytes()
    if vmem_cap >= 96 * 1024 * 1024:          # v5e / v6e: 128 MiB physical VMEM
        block_budget = 8 * 1024 * 1024        # -> 32 MiB of input buffers
        vmem_limit = 100 * 1024 * 1024
    else:                                     # v7x: 64 MiB per TensorCore
        block_budget = 5 * 1024 * 1024        # -> 20 MiB of input buffers
        vmem_limit = 48 * 1024 * 1024

    # Lane-aligned K tile from the block budget; no HBM padding pass — the
    # partial last tile is masked in-kernel instead.
    tk = block_budget // max(1, C * itemsize)
    tk = max(128, (tk // 128) * 128)
    tk = min(tk, pl.cdiv(HW, 128) * 128)
    n_k = pl.cdiv(HW, tk)
    needs_mask = (HW % tk) != 0

    # Single-image case: split the K reduction over a leading parallel axis so
    # both v7x TensorCores are busy. Each split keeps its own accumulator and
    # emits a partial (C, C) gram difference (scalar partials cannot be summed
    # across splits because the loss squares the *total* difference).
    if B == 1 and n_k >= 2 and n_k % 2 == 0:
        n_split, kps, emit_gram = 2, n_k // 2, True
    else:
        n_split, kps, emit_gram = 1, n_k, False

    gram_scale = 1.0 / float(B * C * H * W)   # gram_matrix's .div(b*c*h*w)
    inv_mse_denom = 1.0 / float(B * C * C)    # MSE mean over (B, C, C)

    kernel = functools.partial(
        _style_loss_kernel, hw=HW, tk=tk, kps=kps, needs_mask=needs_mask,
        emit_gram=emit_gram, gram_scale=gram_scale, inv_mse_denom=inv_mse_denom)

    in_spec = pl.BlockSpec((1, C, tk), lambda s, b, k: (b, 0, s * kps + k))
    if emit_gram:
        out_shape = jax.ShapeDtypeStruct((n_split, B, C, C), jnp.float32)
        out_specs = pl.BlockSpec((1, 1, C, C), lambda s, b, k: (s, b, 0, 0))
    else:
        out_shape = jax.ShapeDtypeStruct((n_split, B, 1, 128), jnp.float32)
        out_specs = pl.BlockSpec((1, 1, 1, 128), lambda s, b, k: (s, b, 0, 0))

    out = pl.pallas_call(
        kernel,
        out_shape=out_shape,
        grid_spec=pltpu.PrefetchScalarGridSpec(
            num_scalar_prefetch=0,
            grid=(n_split, B, kps),
            in_specs=[in_spec, in_spec],
            out_specs=out_specs,
            scratch_shapes=[pltpu.VMEM((C, C), jnp.float32)],
        ),
        compiler_params=pltpu.CompilerParams(
            dimension_semantics=("parallel", "parallel", "arbitrary"),
            vmem_limit_bytes=vmem_limit,
        ),
    )(xf, yf)

    if emit_gram:
        d = jnp.sum(out, axis=0)[0] * gram_scale        # (C, C) total diff
        return jnp.sum(d * d) * inv_mse_denom
    return jnp.sum(out[:, :, 0, 0])


def _style_loss_ref(x, y):
    B, C, H, W = x.shape
    xf = x.reshape(B, C, H * W).astype(jnp.float32)
    yf = y.reshape(B, C, H * W).astype(jnp.float32)
    gx = jnp.einsum("bcd,bed->bce", xf, xf) / (B * C * H * W)
    gy = jnp.einsum("bcd,bed->bce", yf, yf) / (B * C * H * W)
    return jnp.mean((gx - gy) ** 2)


if __name__ == "__main__":
    key = jax.random.PRNGKey(0)
    kx, ky = jax.random.split(key)
    B, C, H, W = 2, 4, 16, 16
    x = jax.random.normal(kx, (B, C, H, W), dtype=jnp.float32)
    y = jax.random.normal(ky, (B, C, H, W), dtype=jnp.float32)

    loss = style_loss(x, y)
    jax.block_until_ready(loss)

    ref = _style_loss_ref(x, y)
    assert jnp.allclose(loss, ref, rtol=1e-5, atol=1e-6), (loss, ref)

    print("KERNEL_OK")
</pallas_src>

<mosaic_0001>
module attributes {stable_mosaic.version = 11 : i64} {
  func.func @_style_loss_kernel(%arg0: i32, %arg1: i32, %arg2: i32, %arg3: memref<1x4x256xf32, #tpu.memory_space<vmem>>, %arg4: memref<1x4x256xf32, #tpu.memory_space<vmem>>, %arg5: memref<1x1x1x128xf32, #tpu.memory_space<vmem>>, %arg6: memref<4x4xf32, #tpu.memory_space<vmem>>) attributes {dimension_semantics = [#tpu.dimension_semantics<parallel>, #tpu.dimension_semantics<parallel>, #tpu.dimension_semantics<arbitrary>], iteration_bounds = array<i64: 1, 2, 1>, scalar_prefetch = 0 : i64, scratch_operands = 1 : i64, tpu.core_type = #tpu.core_type<tc>, window_params = [{transform_indices = @transform_0, window_bounds = array<i64: 1, 4, 256>}, {transform_indices = @transform_1, window_bounds = array<i64: 1, 4, 256>}, {transform_indices = @transform_2, window_bounds = array<i64: 1, 1, 1, 128>}]} {
    %c0 = arith.constant 0 : index
    %c0_0 = arith.constant 0 : index
    %c0_1 = arith.constant 0 : index
    %0 = vector.load %arg3[%c0, %c0_0, %c0_1] : memref<1x4x256xf32, #tpu.memory_space<vmem>>, vector<1x4x256xf32>
    %1 = vector.shape_cast %0 : vector<1x4x256xf32> to vector<4x256xf32>
    %c0_2 = arith.constant 0 : index
    %c0_3 = arith.constant 0 : index
    %c0_4 = arith.constant 0 : index
    %2 = vector.load %arg4[%c0_2, %c0_3, %c0_4] : memref<1x4x256xf32, #tpu.memory_space<vmem>>, vector<1x4x256xf32>
    %3 = vector.shape_cast %2 : vector<1x4x256xf32> to vector<4x256xf32>
    %cst = arith.constant dense<0.000000e+00> : vector<4x4xf32>
    %4 = tpu.matmul %1, %1, %cst {dimension_numbers = #tpu.dot_dimension_numbers<[1], [1], [0], [0], [0, 0, 1, 0], [], []>} : vector<4x256xf32>, vector<4x256xf32>, vector<4x4xf32> -> vector<4x4xf32>
    %cst_5 = arith.constant dense<0.000000e+00> : vector<4x4xf32>
    %5 = tpu.matmul %3, %3, %cst_5 {dimension_numbers = #tpu.dot_dimension_numbers<[1], [1], [0], [0], [0, 0, 1, 0], [], []>} : vector<4x256xf32>, vector<4x256xf32>, vector<4x4xf32> -> vector<4x4xf32>
    %6 = arith.subf %4, %5 : vector<4x4xf32>
    %c0_i32 = arith.constant 0 : i32
    %7 = arith.cmpi eq, %arg2, %c0_i32 : i32
    %8 = arith.extui %7 : i1 to i32
    %c0_i32_6 = arith.constant 0 : i32
    %9 = arith.cmpi ne, %8, %c0_i32_6 : i32
    scf.if %9 {
      %c0_11 = arith.constant 0 : index
      %c0_12 = arith.constant 0 : index
      %16 = vector.load %arg6[%c0_11, %c0_12] : memref<4x4xf32, #tpu.memory_space<vmem>>, vector<4x4xf32>
      tpu.vector_store %arg6[%c0_11, %c0_12], %6 {strides = array<i32>} : memref<4x4xf32, #tpu.memory_space<vmem>>, vector<4x4xf32>,
    } else {
    }
    %c0_i32_7 = arith.constant 0 : i32
    %10 = arith.cmpi sgt, %arg2, %c0_i32_7 : i32
    %11 = arith.extui %10 : i1 to i32
    %c0_i32_8 = arith.constant 0 : i32
    %12 = arith.cmpi ne, %11, %c0_i32_8 : i32
    scf.if %12 {
      %c0_11 = arith.constant 0 : index
      %c0_12 = arith.constant 0 : index
      %16 = vector.load %arg6[%c0_11, %c0_12] : memref<4x4xf32, #tpu.memory_space<vmem>>, vector<4x4xf32>
      %17 = arith.addf %16, %6 : vector<4x4xf32>
      %c0_13 = arith.constant 0 : index
      %c0_14 = arith.constant 0 : index
      %18 = vector.load %arg6[%c0_13, %c0_14] : memref<4x4xf32, #tpu.memory_space<vmem>>, vector<4x4xf32>
      tpu.vector_store %arg6[%c0_13, %c0_14], %17 {strides = array<i32>} : memref<4x4xf32, #tpu.memory_space<vmem>>, vector<4x4xf32>,
    } else {
    }
    %c0_i32_9 = arith.constant 0 : i32
    %13 = arith.cmpi eq, %arg2, %c0_i32_9 : i32
    %14 = arith.extui %13 : i1 to i32
    %c0_i32_10 = arith.constant 0 : i32
    %15 = arith.cmpi ne, %14, %c0_i32_10 : i32
    scf.if %15 {
      %c0_11 = arith.constant 0 : index
      %c0_12 = arith.constant 0 : index
      %16 = vector.load %arg6[%c0_11, %c0_12] : memref<4x4xf32, #tpu.memory_space<vmem>>, vector<4x4xf32>
      %cst_13 = arith.constant 4.8828125E-4 : f32
      %17 = vector.broadcast %cst_13 : f32 to vector<4x4xf32>
      %18 = arith.mulf %16, %17 : vector<4x4xf32>
      %19 = arith.mulf %18, %18 : vector<4x4xf32>
      %20 = vector.shape_cast %19 : vector<4x4xf32> to vector<1x4x4xf32>
      %cst_14 = arith.constant dense<0.000000e+00> : vector<1xf32>
      %21 = vector.multi_reduction <add>, %20, %cst_14 [1, 2] : vector<1x4x4xf32> to vector<1xf32>
      %22 = vector.shape_cast %21 : vector<1xf32> to vector<1x1x1xf32>
      %23 = vector.extract %22[0, 0, 0] : f32 from vector<1x1x1xf32>
      %cst_15 = arith.constant 3.125000e-02 : f32
      %24 = arith.mulf %23, %cst_15 : f32
      %25 = vector.broadcast %24 : f32 to vector<1x1x1x128xf32>
      %c0_16 = arith.constant 0 : index
      %c0_17 = arith.constant 0 : index
      %c0_18 = arith.constant 0 : index
      %c0_19 = arith.constant 0 : index
      %26 = vector.load %arg5[%c0_16, %c0_17, %c0_18, %c0_19] : memref<1x1x1x128xf32, #tpu.memory_space<vmem>>, vector<1x1x1x128xf32>
      tpu.vector_store %arg5[%c0_16, %c0_17, %c0_18, %c0_19], %25 {strides = array<i32>} : memref<1x1x1x128xf32, #tpu.memory_space<vmem>>, vector<1x1x1x128xf32>,
    } else {
    }
    return
  }
  func.func @transform_0(%arg0: i32, %arg1: i32, %arg2: i32) -> (i32, i32, i32) {
    %c1_i32 = arith.constant 1 : i32
    %0 = arith.muli %arg0, %c1_i32 : i32
    %1 = arith.addi %0, %arg2 : i32
    %c0_i32 = arith.constant 0 : i32
    %c0_i32_0 = arith.constant 0 : i32
    return %arg1, %c0_i32, %1 : i32, i32, i32
  }
  func.func @transform_1(%arg0: i32, %arg1: i32, %arg2: i32) -> (i32, i32, i32) {
    %c1_i32 = arith.constant 1 : i32
    %0 = arith.muli %arg0, %c1_i32 : i32
    %1 = arith.addi %0, %arg2 : i32
    %c0_i32 = arith.constant 0 : i32
    %c0_i32_0 = arith.constant 0 : i32
    return %arg1, %c0_i32, %1 : i32, i32, i32
  }
  func.func @transform_2(%arg0: i32, %arg1: i32, %arg2: i32) -> (i32, i32, i32, i32) {
    %c0_i32 = arith.constant 0 : i32
    %c0_i32_0 = arith.constant 0 : i32
    %c0_i32_1 = arith.constant 0 : i32
    return %arg0, %arg1, %c0_i32, %c0_i32_0 : i32, i32, i32, i32
  }
}

</mosaic_0001>

<bundles_post_ra>
// kernel: tpu_custom_call.1
= control target key start
LH: loop header
LB: loop body
LE: loop exit
PB: predicated region body
PF: predicated region fallthrough
CT: control target
= control target key end

     0   :  { %7 = vsyncpa [#allocation4], 0  ;;  %s882_s0 = inlined_call_operand.hbm [shape: f32[2,4,256], index: 0, kind: input, shape index: {}]   ;;  %s883_s1 = inlined_call_operand.hbm [shape: f32[2,4,256], index: 1, kind: input, shape index: {}]   ;;  %s884_s2 = inlined_call_operand.hbm [shape: f32[1,2,1,128], index: 2, kind: output, shape index: {}]  }
   0x1   :  { %9 = vsyncpa [#allocation4 + $0x1], 0 }
   0x2   :  { %10 = vsyncpa [#allocation7], 0 }
   0x3   :  { %12 = vsyncpa [#allocation7 + $0x1], 0 }
   0x4   :  { %13 = vsyncpa [#allocation5], 0 }
   0x5   :  { %15 = vsyncpa [#allocation5 + $0x1], 0  ;;  %s753_s9 = smov 0   ;;  %s755_s10 = smov 0  }
   0x6   :  { %s757_s11 = smov 0   ;;  %s759_s12 = smov 0  }
   0x7   :  { %s761_s13 = smov 0   ;;  %s763_s14 = smov 0  }
   0x8 LB: > { %s504_s15 = sadd.s32 4294967295, %s736_s14   ;;  %s505_s16 = sadd.s32 4294967294, %s736_s14   ;;  %s736_s14 = sphi %s763_s14, %s21_s14   ;;  %s732_s13 = sphi %s761_s13, %s893_s13   ;;  %s728_s12 = sphi %s759_s12, %s892_s12   ;;  %s724_s11 = sphi %s757_s11, %s891_s11   ;;  %s720_s10 = sphi %s755_s10, %s890_s10   ;;  %s716_s9 = sphi %s753_s9, %s889_s9  }
   0x9   : > { %s36_s17 = sadd.s32 1, %s732_s13  ;;  %s51_s18 = sadd.s32 1, %s724_s11 }
   0xa   : > { %p38_p0 = scmp.ge.s32.totalorder %s36_s17, 2  ;;  %p58_p1 = scmp.ne.s32.totalorder %s724_s11, %s720_s10 }
   0xb   : > { %p59_p2 = scmp.eq.s32.totalorder %s736_s14, 0  ;;  %p64_p3 = scmp.ne.s32.totalorder %s720_s10, %s716_s9 }
   0xc   : > { %s895_s17 = smov (%p38_p0, %s36_s17), 0  ;;  %p65_p5 = scmp.eq.s32.totalorder %s504_s15, 0 }
   0xd   : > { %p794_p4 = por %p59_p2, %p58_p1  ;;  %s46_s20 = ssub.s32 %s732_s13, %s895_s17 }
   0xe   : > { %p120_p6 = scmp.eq.s32.totalorder %s504_s15, 1  ;;  %p49_p7 = scmp.eq.s32.totalorder %s46_s20, 0 }
   0xf   : > { %p800_p8 = por %p65_p5, %p64_p3  ;;  %p126_p10 = scmp.eq.s32.totalorder %s505_s16, 1 }
  0x10   : > { %p804_p9 = por %p120_p6, %p58_p1  ;;  %p507_p12 = scmp.ge.s32.totalorder %s736_s14, 2 }
  0x11   : > { %s809_s23 = scalar_select %p49_p7, %s724_s11, %s51_s18  }
  0x12   : > { %p811_p11 = por %p126_p10, %p64_p3  ;;  %p540_p13 = scmp.lt.s32.totalorder %s736_s14, 2 }
  0x13   : > { %s146_s25 = sand.u32 1, %s724_s11   ;;  %s519_s27 = sshll.u32 %s732_s13, 3 }
  0x14   : > { %s508_s26 = sshll.u32 %s146_s25, 3  ;;  %s158_s30 = scalar_lea.hbm %s882_s0, %s519_s27 }
  0x15   : > { %s150_s3 = scalar_lea.vmem [#allocation3], %s508_s26  ;;  %s160_s5 = sshll.u32 %s158_s30, 4  ;;  %s161_s5 = int_to_ptr.hbm [resolvable:$true] %s160_s5 }
  0x16   : > { %s162_s4 = sshll.u32 %s150_s3, 4  ;;  %p530_p0 = pnand %p540_p13, %p794_p4  ;;  %s163_s4 = int_to_ptr.vmem [resolvable:$true] %s162_s4 }
  0x17   : > { %p514_p1 = scmp.ge.s32.totalorder %s736_s14, 1  ;;  %p190_p2 = scmp.lt.s32.totalorder %s736_s14, 3 }
  0x18   : > { %s147_s6 = scalar_lea.sflag [#allocation4], %s146_s25  ;;  %s181_s15 = scalar_lea.hbm %s883_s1, %s519_s27 }
  0x19   : > { %532 = dma.hbm_to_vmem [thread:$0]  (!%p530_p0), %s161_s5, 128, %s163_s4, %s147_s6  }
  0x1a   : > { %p191_p3 = pnand %p514_p1, %p190_p2  ;;  %s173_s16 = scalar_lea.vmem [#allocation6], %s508_s26 }
  0x1b   : > { %s185_s18 = sshll.u32 %s173_s16, 4  ;;  %s183_s20 = sshll.u32 %s181_s15, 4  ;;  %s186_s18 = int_to_ptr.vmem [resolvable:$true] %s185_s18  ;;  %s184_s20 = int_to_ptr.hbm [resolvable:$true] %s183_s20 }
  0x1c   : > { %s170_s28 = scalar_lea.sflag [#allocation7], %s146_s25  ;;  %194 = sbr.rel (%p191_p3) target bundleno = 405 (0x195), region = 28 }
  0x1d   : > { %535 = dma.hbm_to_vmem [thread:$0]  (!%p530_p0), %s184_s20, 128, %s186_s18, %s170_s28  }
  0x1e   : > { %s830_s19 = sand.u32 (!%p191_p3), 1, %s720_s10  }
  0x1f   : > { %s515_s29 = sshll.u32 (!%p191_p3), %s830_s19, 3  ;;  %s197_s30 = scalar_lea.sflag (!%p191_p3), [#allocation4], %s830_s19 }
  0x20   : > { %s200_s3 = scalar_lea.vmem (!%p191_p3), [#allocation3], %s515_s29 }
  0x21   : > { %703 = dma.done.wait (%p800_p8), %s197_s30, 128  }
  0x22   : > { %705 = vsyncadd (%p800_p8), %s197_s30, 4294967168  ;;  %s207_s26 = scalar_lea.sflag [#allocation7], %s830_s19  ;;  %s210_s25 = scalar_lea.vmem [#allocation6], %s515_s29 }
  0x23   : > { %707 = dma.done.wait (%p800_p8), %s207_s26, 128  }
  0x24   : > { %709 = vsyncadd (%p800_p8), %s207_s26, 4294967168  ;;  %v240_v0 = vld [vmem:[%s200_s3] sm:$0xff]  ;;  %v241_v3 = vld [vmem:[%s210_s25] sm:$0xff]  ;;  %vm349_vm0 = vcmask 27648   ;;  %s390_s4 = scalar_lea.hbm %s884_s2, %s728_s12  ;;  %s235_s5 = scalar_lea.vmem [#allocation8], %s830_s19 }
  0x25   : > { %243 = vst [vmem:[#allocation1] ss:$2 sm:$0xff] %v240_v0  ;;  %s392_s6 = sshll.u32 %s235_s5, 4  ;;  %s394_s7 = sshll.u32 %s390_s4, 4  ;;  %s393_s6 = int_to_ptr.vmem [resolvable:$true] %s392_s6  ;;  %s395_s7 = int_to_ptr.hbm [resolvable:$true] %s394_s7 }
  0x26   : > { %s380_s16 = scalar_lea.sflag [#allocation5], %s830_s19  ;;  %s664_s18 = sshra.s32 %s395_s7, 4  ;;  %s665_s18 = int_to_ptr.hbm [resolvable:$true] %s664_s18 }
  0x27   : > { %s666_s20 = scalar_lea.hbm %s665_s18, 1  ;;  %s670_s12 = scalar_lea.hbm %s884_s2, 2 }
  0x28   : > { %p667_p4 = scmp.ne.s32.totalorder %s665_s18, %s666_s20  ;;  %p671_p7 = scmp.lt.s32.totalorder %s665_s18, %s884_s2 }
  0x29   : > { %p672_p8 = scmp.lt.s32.totalorder %s670_s12, %s666_s20 }
  0x2a   : > { %p668_p5 = pnand %p667_p4, %p804_p9 }
  0x2b   : > { %p673_p10 = por %p672_p8, %p671_p7 }
  0x2c   : > { %v244_v1 = vld.sshfl [vmem:[#allocation1] sm:$0xff pattern:$0x75316420]  ;;  %v245_v2 = vld.sshfl [vmem:[#allocation1 + $0x8] sm:$0xff pattern:$0x75316420]  ;;  %p669_p6 = pneg %p668_p5 }
  0x2d   : > { %248 = vst [vmem:[#allocation1] ss:$2 sm:$0xff] %v240_v0 }
  0x2e   : > { %p674_p13 = pnand %p673_p10, %p669_p6 }
  0x34   : > { %v249_v4 = vld.sshfl [vmem:[#allocation1] sm:$0xff pattern:$0x75316420]  ;;  %v250_v5 = vld.sshfl [vmem:[#allocation1 + $0x8] sm:$0xff pattern:$0x75316420] }
  0x35   : > { %294 = vst [vmem:[#allocation1] ss:$2 sm:$0xff] %v241_v3  ;;  %268 = vmatpush.xpose.msra.mxu0 %v249_v4  ;;  %288 = vmatpush.xpose.msra.mxu1 %v250_v5 }
  0x38   : > { %269 = vmatmul.f32.vlgmr.msra.gmra.mxu0 %v244_v1  ;;  %289 = vmatmul.f32.vlgmr.msra.gmra.mxu1 %v245_v2 }
  0x3c   : > { %v295_v6 = vld.sshfl [vmem:[#allocation1] sm:$0xff pattern:$0x75316420]  ;;  %v296_v7 = vld.sshfl [vmem:[#allocation1 + $0x8] sm:$0xff pattern:$0x75316420] }
  0x3d   : > { %299 = vst [vmem:[#allocation1] ss:$2 sm:$0xff] %v241_v3 }
  0x44   : > { %v300_v8 = vld.sshfl [vmem:[#allocation1] sm:$0xff pattern:$0x75316420]  ;;  %v301_v9 = vld.sshfl [vmem:[#allocation1 + $0x8] sm:$0xff pattern:$0x75316420] }
  0x45   : > { %319 = vmatpush.xpose.msra.mxu2 %v300_v8  ;;  %339 = vmatpush.xpose.msra.mxu3 %v301_v9 }
  0x48   : > { %320 = vmatmul.f32.vlgmr.msra.gmra.mxu2 %v295_v6  ;;  %340 = vmatmul.f32.vlgmr.msra.gmra.mxu3 %v296_v7 }
  0xb5   : > { %v270_v10 = vpop.f32.mrf.mxu0  ;;  %v290_v11 = vpop.f32.mrf.mxu1 }
  0xb6   : > { %v291_v12 = vadd.f32 %v290_v11, %v270_v10 }
  0xcb   : > { %v321_v13 = vpop.f32.mrf.mxu2  ;;  %v341_v14 = vpop.f32.mrf.mxu3 }
  0xcc   : > { %v342_v15 = vadd.f32 %v341_v14, %v321_v13 }
  0xce   : > { %v344_v16 = vsub.f32 %v291_v12, %v342_v15 }
  0xd0   : > { %350 = vst.msk [vmem:[#allocation2] sm:$0xf] %vm349_vm0, %v344_v16 }
  0xd7   : > { %v362_v17 = vld [vmem:[#allocation2] sm:$0xf] }
  0xd8   : > { %v363_v18 = vmul.f32 0.00048828125, %v362_v17 }
  0xda   : > { %v364_v19 = vmul.f32 %v363_v18, %v363_v18 }
  0xdc   : > { %v366_v20 = vsel %vm349_vm0, %v364_v19, 0.0 }
  0xdd   : > { %367 = vadd.xlane.f32.xlu0 %v366_v20 }
 0x150   : > { %v368_v21 = vpop.xlane.xlu0 %367 }
 0x151   : > { %v369_v22 = vrot.slane %v368_v21, 4 }
 0x153   : > { %v370_v23 = vadd.f32 %v369_v22, %v368_v21 }
 0x155   : > { %v371_v24 = vrot.slane %v370_v23, 2 }
 0x157   : > { %v372_v25 = vadd.f32 %v371_v24, %v370_v23 }
 0x159   : > { %v373_v26 = vrot.slane %v372_v25, 1 }
 0x15b   : > { %v374_v27 = vadd.f32 %v373_v26, %v372_v25 }
 0x15d   : > { %521 = vpush %v374_v27 }
 0x18e   : > { %s522_s8 = spop %521 }
 0x18f   : > { %s376_s15 = smul.f32 0.03125, %s522_s8 }
 0x191   : > { %v377_v28 = vstv %s376_s15 }
 0x192   : > { %378 = vst [vmem:[%s235_s5] sm:$0x1] %v377_v28 }
 0x193   : > { %677 = shalt.err (!%p674_p13)
}
 0x194   : > { %527 = dma.vmem_to_hbm [thread:$0]  (%p804_p9), %s393_s6, 16, %s395_s7, %s380_s16  }
 0x195 PF: > { %s406_s19 = sand.u32 1, %s716_s9   ;;  %p537_p0 = pnand %p507_p12, %p811_p11 }
 0x196   : > { %s407_s26 = scalar_lea.sflag [#allocation5], %s406_s19 }
 0x197   : > { %p538_p1 = pneg %p537_p0 }
 0x199   : > { %711 = dma.done.wait (%p538_p1), %s407_s26, 16  }
 0x19a   : > { %713 = vsyncadd (%p538_p1), %s407_s26, 4294967280  ;;  %s21_s14 = sadd.s32 1, %s736_s14   ;;  %s889_s9 = smov %s720_s10 }
 0x19b   : > { %p18_p2 = scmp.ge.s32.totalorder %s21_s14, 4   ;;  %s890_s10 = smov %s724_s11 }
 0x19c   : > { %s891_s11 = smov %s809_s23  ;;  %s892_s12 = smov %s732_s13 }
 0x19d   : > { %s893_s13 = smov %s895_s17  ;;  %20 = sbr.rel (!%p18_p2) target bundleno = 8 (0x8), region = 98 }
 0x1a2   :  { %412 = vsyncpa [#allocation4], 1 }
 0x1a3   :  { %414 = vsyncpa [#allocation4 + $0x1], 1 }
 0x1a4   :  { %415 = vsyncpa [#allocation7], 1 }
 0x1a5   :  { %417 = vsyncpa [#allocation7 + $0x1], 1 }
 0x1a6   :  { %418 = vsyncpa [#allocation5], 1 }
 0x1a7   :  { %420 = vsyncpa [#allocation5 + $0x1], 1 }

</bundles_post_ra>
